<compile_context>
chip_gen: v7x
topology: tpu7x:2x2x1
jax: 0.10.0
libtpu: 0.0.40
codegen_flags: <defaults>
</compile_context>

<pallas_src>
import jax
import jax.numpy as jnp
import numpy as np
from jax.experimental import pallas as pl
from jax.experimental.pallas import tpu as pltpu

BN_EPS = 1e-5


# ----------------------------- fused kernel -------------------------------- #

def _make_generator_kernel(num_hidden):
    """Build the fused whole-network kernel for `num_hidden` hidden blocks.

    Ref order: (z, [w_i, gamma_beta_i] * num_hidden, w_final_tile, b_final_tile,
    out_tile).  The grid iterates over lane-aligned tiles of the final layer's
    padded N; all hidden-layer operands use a constant index_map so they stay
    VMEM-resident across grid steps.
    """

    def kernel(*refs):
        x = refs[0][...]                                    # (B, latent) f32
        pos = 1
        for _ in range(num_hidden):
            w_ref, gb_ref = refs[pos], refs[pos + 1]
            pos += 2
            # Linear on the MXU: bf16 x bf16 -> f32 accumulation.  The nn.Linear
            # bias is omitted: training-mode BatchNorm subtracts the batch mean
            # per feature, which cancels a constant per-feature bias exactly.
            y = jnp.dot(x.astype(jnp.bfloat16), w_ref[...],
                        preferred_element_type=jnp.float32)          # (B, H) f32
            # BatchNorm1d (training): biased batch stats, two-pass variance,
            # affine folded into per-feature scale/shift (all on (1, H) vectors;
            # only 2 elementwise ops touch the full (B, H) tile).
            mean = jnp.mean(y, axis=0, keepdims=True)                 # (1, H)
            var = jnp.mean((y - mean) ** 2, axis=0, keepdims=True)    # (1, H)
            gamma = gb_ref[0:1, :]
            beta = gb_ref[1:2, :]
            scale = gamma * jax.lax.rsqrt(var + BN_EPS)               # (1, H)
            shift = beta - mean * scale                               # (1, H)
            x = jnp.maximum(y * scale + shift, 0.0)                   # ReLU, f32

        w_f_ref, b_f_ref, o_ref = refs[pos], refs[pos + 1], refs[pos + 2]
        o_ref[...] = (
            jnp.dot(x.astype(jnp.bfloat16), w_f_ref[...],
                    preferred_element_type=jnp.float32)
            + b_f_ref[...]
        )

    return kernel


# ----------------------------- wrapper -------------------------------------- #

def generator_forward(z, params):
    """Forward pass of the anoGAN Generator as one fused pallas_call.

    params = {"hidden": [{"w": (K,H) bf16, "b": (1,H) f32, "gamma_beta": (2,H) f32}, ...],
              "final":  {"w": (K,Npad) bf16, "b": (1,Npad) f32, "out_dim": int}}
    Returns (B, out_dim) f32 (padding is sliced off outside the kernel).
    """
    num_hidden = len(params["hidden"])
    w_f = params["final"]["w"]
    b_f = params["final"]["b"]
    out_dim = params["final"]["out_dim"]
    B, latent = z.shape
    n_pad = w_f.shape[1]

    # Two lane-aligned N tiles if possible (feeds both v7x TCs, overlaps the
    # second w_final tile's DMA with the first tile's compute elsewhere).
    if n_pad % 256 == 0 and (n_pad // 2) % 128 == 0:
        n_tile = n_pad // 2
    else:
        n_tile = n_pad
    n_steps = n_pad // n_tile

    flat = [z]
    in_specs = [pl.BlockSpec((B, latent), lambda j: (0, 0))]
    for layer in params["hidden"]:
        flat += [layer["w"], layer["gamma_beta"]]          # bias dropped (see kernel)
        in_specs += [
            pl.BlockSpec(layer["w"].shape, lambda j: (0, 0)),
            pl.BlockSpec(layer["gamma_beta"].shape, lambda j: (0, 0)),
        ]
    flat += [w_f, b_f]
    in_specs += [
        pl.BlockSpec((w_f.shape[0], n_tile), lambda j: (0, j)),
        pl.BlockSpec((1, n_tile), lambda j: (0, j)),
    ]
    out_spec = pl.BlockSpec((B, n_tile), lambda j: (0, j))

    flops = 2 * B * (
        sum(l["w"].shape[0] * l["w"].shape[1] for l in params["hidden"])
        + w_f.shape[0] * n_pad
    )
    transcendentals = sum(l["w"].shape[1] for l in params["hidden"])  # rsqrt per feature
    bytes_accessed = sum(int(np.prod(a.shape)) * a.dtype.itemsize for a in flat)
    bytes_accessed += B * n_pad * 4  # output

    out_pad = pl.pallas_call(
        _make_generator_kernel(num_hidden),
        out_shape=jax.ShapeDtypeStruct((B, n_pad), jnp.float32),
        grid=(n_steps,),
        in_specs=in_specs,
        out_specs=out_spec,
        compiler_params=pltpu.CompilerParams(dimension_semantics=("parallel",)),
        cost_estimate=pl.CostEstimate(
            flops=flops, transcendentals=transcendentals,
            bytes_accessed=bytes_accessed),
    )(*flat)
    return out_pad[:, :out_dim]


# ----------------------------- param init ---------------------------------- #

def init_generator_params(key, latent_dim, hidden_dims, output_dim):
    """Deterministic init mimicking PyTorch nn.Linear (U[-1/sqrt(fan_in), ...]).

    Matmul weights are stored bf16 (MXU-native); biases / BN params stay f32.
    The final layer's N is zero-padded to a multiple of 256 (lane/MXU aligned).
    """
    hidden = []
    in_dim = latent_dim
    for h in hidden_dims:
        key, kw, kb = jax.random.split(key, 3)
        bound = 1.0 / np.sqrt(in_dim)
        w = jax.random.uniform(kw, (in_dim, h), jnp.float32, -bound, bound)
        b = jax.random.uniform(kb, (1, h), jnp.float32, -bound, bound)
        gamma_beta = jnp.concatenate(
            [jnp.ones((1, h), jnp.float32), jnp.zeros((1, h), jnp.float32)], axis=0
        )  # BatchNorm1d affine init, packed (2, H) -> single operand/DMA
        hidden.append({"w": w.astype(jnp.bfloat16), "b": b, "gamma_beta": gamma_beta})
        in_dim = h

    key, kw, kb = jax.random.split(key, 3)
    bound = 1.0 / np.sqrt(in_dim)
    w_f = jax.random.uniform(kw, (in_dim, output_dim), jnp.float32, -bound, bound)
    b_f = jax.random.uniform(kb, (1, output_dim), jnp.float32, -bound, bound)
    n_pad = int(-(-output_dim // 256) * 256)               # 1100 -> 1280
    w_f = jnp.pad(w_f, ((0, 0), (0, n_pad - output_dim))).astype(jnp.bfloat16)
    b_f = jnp.pad(b_f, ((0, 0), (0, n_pad - output_dim)))
    return {"hidden": hidden, "final": {"w": w_f, "b": b_f, "out_dim": output_dim}}


# ----------------------------- reference ------------------------------------ #

def generator_reference(z, params):
    """Pure-JAX f32 reference with full PyTorch semantics (hidden bias included)."""
    x = z
    for layer in params["hidden"]:
        y = x @ layer["w"].astype(jnp.float32) + layer["b"]
        mean = jnp.mean(y, axis=0, keepdims=True)
        var = jnp.mean((y - mean) ** 2, axis=0, keepdims=True)
        gamma = layer["gamma_beta"][0:1, :]
        beta = layer["gamma_beta"][1:2, :]
        y = gamma * (y - mean) * jax.lax.rsqrt(var + BN_EPS) + beta
        x = jnp.maximum(y, 0.0)
    out = x @ params["final"]["w"].astype(jnp.float32) + params["final"]["b"]
    return out[:, :params["final"]["out_dim"]]


# ----------------------------- main ----------------------------------------- #

if __name__ == "__main__":
    latent_dim = 128
    hidden_dims = [256]          # exercises the fused Linear+BN+ReLU path
    output_dim = 1100            # module default; padded to 1280 internally
    batch = 8                    # small test batch; scale B to fill MXU rows in prod

    key = jax.random.PRNGKey(0)
    key, kz = jax.random.split(key)
    z = jax.random.normal(kz, (batch, latent_dim), jnp.float32)
    params = init_generator_params(key, latent_dim, hidden_dims, output_dim)

    out = jax.block_until_ready(generator_forward(z, params))
    assert out.shape == (batch, output_dim), out.shape

    ref = jax.block_until_ready(generator_reference(z, params))
    # bf16 matmul operands vs f32 reference -> loosened tolerance (per review).
    np.testing.assert_allclose(np.asarray(out), np.asarray(ref), rtol=2e-2, atol=2e-2)

    print("KERNEL_OK")
</pallas_src>

<mosaic_0001>
module attributes {stable_mosaic.version = 11 : i64} {
  func.func @kernel(%arg0: i32, %arg1: memref<8x128xf32, #tpu.memory_space<vmem>>, %arg2: memref<128x256xbf16, #tpu.memory_space<vmem>>, %arg3: memref<2x256xf32, #tpu.memory_space<vmem>>, %arg4: memref<256x640xbf16, #tpu.memory_space<vmem>>, %arg5: memref<1x640xf32, #tpu.memory_space<vmem>>, %arg6: memref<8x640xf32, #tpu.memory_space<vmem>>) attributes {dimension_semantics = [#tpu.dimension_semantics<parallel>], iteration_bounds = array<i64: 2>, scalar_prefetch = 0 : i64, scratch_operands = 0 : i64, tpu.core_type = #tpu.core_type<tc>, window_params = [{pipeline_mode = #tpu.pipeline_mode<synchronous>, transform_indices = @transform_0, window_bounds = array<i64: 8, 128>}, {pipeline_mode = #tpu.pipeline_mode<synchronous>, transform_indices = @transform_1, window_bounds = array<i64: 128, 256>}, {pipeline_mode = #tpu.pipeline_mode<synchronous>, transform_indices = @transform_2, window_bounds = array<i64: 2, 256>}, {transform_indices = @transform_3, window_bounds = array<i64: 256, 640>}, {transform_indices = @transform_4, window_bounds = array<i64: 1, 640>}, {transform_indices = @transform_5, window_bounds = array<i64: 8, 640>}]} {
    %c0 = arith.constant 0 : index
    %c0_0 = arith.constant 0 : index
    %0 = vector.load %arg1[%c0, %c0_0] : memref<8x128xf32, #tpu.memory_space<vmem>>, vector<8x128xf32>
    %1 = arith.truncf %0 : vector<8x128xf32> to vector<8x128xbf16>
    %c0_1 = arith.constant 0 : index
    %c0_2 = arith.constant 0 : index
    %2 = vector.load %arg2[%c0_1, %c0_2] : memref<128x256xbf16, #tpu.memory_space<vmem>>, vector<128x256xbf16>
    %cst = arith.constant dense<0.000000e+00> : vector<8x256xf32>
    %3 = tpu.matmul %1, %2, %cst {dimension_numbers = #tpu.dot_dimension_numbers<[1], [0], [0], [1], [0, 0, 1, 1], [], []>} : vector<8x128xbf16>, vector<128x256xbf16>, vector<8x256xf32> -> vector<8x256xf32>
    %cst_3 = arith.constant dense<0.000000e+00> : vector<256xf32>
    %4 = vector.multi_reduction <add>, %3, %cst_3 [0] : vector<8x256xf32> to vector<256xf32>
    %5 = vector.shape_cast %4 : vector<256xf32> to vector<1x256xf32>
    %cst_4 = arith.constant 8.000000e+00 : f32
    %6 = vector.broadcast %cst_4 : f32 to vector<1x256xf32>
    %7 = arith.divf %5, %6 : vector<1x256xf32>
    %8 = vector.broadcast %7 : vector<1x256xf32> to vector<8x256xf32>
    %9 = arith.subf %3, %8 : vector<8x256xf32>
    %10 = arith.mulf %9, %9 : vector<8x256xf32>
    %cst_5 = arith.constant dense<0.000000e+00> : vector<256xf32>
    %11 = vector.multi_reduction <add>, %10, %cst_5 [0] : vector<8x256xf32> to vector<256xf32>
    %12 = vector.shape_cast %11 : vector<256xf32> to vector<1x256xf32>
    %cst_6 = arith.constant 8.000000e+00 : f32
    %13 = vector.broadcast %cst_6 : f32 to vector<1x256xf32>
    %14 = arith.divf %12, %13 : vector<1x256xf32>
    %c0_7 = arith.constant 0 : index
    %c0_8 = arith.constant 0 : index
    %15 = vector.load %arg3[%c0_7, %c0_8] : memref<2x256xf32, #tpu.memory_space<vmem>>, vector<1x256xf32>
    %c1 = arith.constant 1 : index
    %c0_9 = arith.constant 0 : index
    %16 = vector.load %arg3[%c1, %c0_9] : memref<2x256xf32, #tpu.memory_space<vmem>>, vector<1x256xf32>
    %cst_10 = arith.constant 9.99999974E-6 : f32
    %17 = vector.broadcast %cst_10 : f32 to vector<1x256xf32>
    %18 = arith.addf %14, %17 : vector<1x256xf32>
    %19 = math.rsqrt %18 : vector<1x256xf32>
    %20 = arith.mulf %15, %19 : vector<1x256xf32>
    %21 = arith.mulf %7, %20 : vector<1x256xf32>
    %22 = arith.subf %16, %21 : vector<1x256xf32>
    %23 = vector.broadcast %20 : vector<1x256xf32> to vector<8x256xf32>
    %24 = arith.mulf %3, %23 : vector<8x256xf32>
    %25 = vector.broadcast %22 : vector<1x256xf32> to vector<8x256xf32>
    %26 = arith.addf %24, %25 : vector<8x256xf32>
    %cst_11 = arith.constant 0.000000e+00 : f32
    %27 = vector.broadcast %cst_11 : f32 to vector<8x256xf32>
    %28 = arith.maximumf %26, %27 : vector<8x256xf32>
    %29 = arith.truncf %28 : vector<8x256xf32> to vector<8x256xbf16>
    %c0_12 = arith.constant 0 : index
    %c0_13 = arith.constant 0 : index
    %30 = vector.load %arg4[%c0_12, %c0_13] : memref<256x640xbf16, #tpu.memory_space<vmem>>, vector<256x640xbf16>
    %cst_14 = arith.constant dense<0.000000e+00> : vector<8x640xf32>
    %31 = tpu.matmul %29, %30, %cst_14 {dimension_numbers = #tpu.dot_dimension_numbers<[1], [0], [0], [1], [0, 0, 1, 1], [], []>} : vector<8x256xbf16>, vector<256x640xbf16>, vector<8x640xf32> -> vector<8x640xf32>
    %c0_15 = arith.constant 0 : index
    %c0_16 = arith.constant 0 : index
    %32 = vector.load %arg5[%c0_15, %c0_16] : memref<1x640xf32, #tpu.memory_space<vmem>>, vector<1x640xf32>
    %33 = vector.broadcast %32 : vector<1x640xf32> to vector<8x640xf32>
    %34 = arith.addf %31, %33 : vector<8x640xf32>
    %c0_17 = arith.constant 0 : index
    %c0_18 = arith.constant 0 : index
    %35 = vector.load %arg6[%c0_17, %c0_18] : memref<8x640xf32, #tpu.memory_space<vmem>>, vector<8x640xf32>
    tpu.vector_store %arg6[%c0_17, %c0_18], %34 {strides = array<i32>} : memref<8x640xf32, #tpu.memory_space<vmem>>, vector<8x640xf32>,
    return
  }
  func.func @transform_0(%arg0: i32) -> (i32, i32) {
    %c0_i32 = arith.constant 0 : i32
    %c0_i32_0 = arith.constant 0 : i32
    %c0_i32_1 = arith.constant 0 : i32
    return %c0_i32, %c0_i32_0 : i32, i32
  }
  func.func @transform_1(%arg0: i32) -> (i32, i32) {
    %c0_i32 = arith.constant 0 : i32
    %c0_i32_0 = arith.constant 0 : i32
    %c0_i32_1 = arith.constant 0 : i32
    return %c0_i32, %c0_i32_0 : i32, i32
  }
  func.func @transform_2(%arg0: i32) -> (i32, i32) {
    %c0_i32 = arith.constant 0 : i32
    %c0_i32_0 = arith.constant 0 : i32
    %c0_i32_1 = arith.constant 0 : i32
    return %c0_i32, %c0_i32_0 : i32, i32
  }
  func.func @transform_3(%arg0: i32) -> (i32, i32) {
    %c0_i32 = arith.constant 0 : i32
    %c0_i32_0 = arith.constant 0 : i32
    return %c0_i32, %arg0 : i32, i32
  }
  func.func @transform_4(%arg0: i32) -> (i32, i32) {
    %c0_i32 = arith.constant 0 : i32
    %c0_i32_0 = arith.constant 0 : i32
    return %c0_i32, %arg0 : i32, i32
  }
  func.func @transform_5(%arg0: i32) -> (i32, i32) {
    %c0_i32 = arith.constant 0 : i32
    %c0_i32_0 = arith.constant 0 : i32
    return %c0_i32, %arg0 : i32, i32
  }
}

</mosaic_0001>

<bundles_post_ra>
// kernel: tpu_custom_call.1
= control target key start
LH: loop header
LB: loop body
LE: loop exit
PB: predicated region body
PF: predicated region fallthrough
CT: control target
= control target key end

     0   :  { %s2216_s0 = inlined_call_operand.hbm [shape: f32[8,128], index: 0, kind: input, shape index: {}]   ;;  %s2217_s1 = inlined_call_operand.hbm [shape: bf16[128,256], index: 1, kind: input, shape index: {}]   ;;  %s2218_s2 = inlined_call_operand.vmem [shape: f32[2,256], index: 2, kind: input, shape index: {}]   ;;  %s2219_s3 = inlined_call_operand.hbm [shape: bf16[256,1280], index: 3, kind: input, shape index: {}]   ;;  %s2220_s4 = inlined_call_operand.vmem [shape: f32[1,1280], index: 4, kind: input, shape index: {}]   ;;  %s2221_s5 = inlined_call_operand.hbm [shape: f32[8,1280], index: 5, kind: output, shape index: {}]  }
   0x1   :  { %2227 = sst [smem:[#allocation14_spill]] %s2216_s0 }
   0x2   :  { %10 = vsyncpa [#allocation3], 0 }
   0x3   :  { %11 = vsyncpa [#allocation6], 0 }
   0x4   :  { %12 = vsyncpa [#allocation4], 0 }
   0x5   :  { %14 = vsyncpa [#allocation4 + $0x1], 0  ;;  %s1871_s18 = smov 0   ;;  %s1873_s19 = smov 0  }
   0x6   :  { %s1875_s20 = smov 0   ;;  %s1877_s21 = smov 0  }
   0x7 LB: > { %s1892_s22 = sadd.s32 4294967295, %s1828_s21   ;;  %s1318_s23 = sadd.s32 4294967294, %s1828_s21   ;;  %s1828_s21 = sphi %s1877_s21, %s2252_s21   ;;  %s1824_s20 = sphi %s1875_s20, %s2251_s20   ;;  %s1820_s19 = sphi %s1873_s19, %s2250_s19   ;;  %s1816_s18 = sphi %s1871_s18, %s2249_s18  }
   0x8   : > { %s1896_s24 = sadd.s32 1, %s1828_s21   ;;  %s90_s25 = sadd.s32 1, %s1824_s20 }
   0x9   : > { %s87_s26 = ssub.s32 %s1828_s21, %s1896_s24  ;;  %p97_p0 = scmp.ne.s32.totalorder %s1824_s20, %s1820_s19 }
   0xa   : > { %p88_p1 = scmp.eq.s32.totalorder %s87_s26, 0  ;;  %p98_p2 = scmp.eq.s32.totalorder %s1828_s21, 0 }
   0xb   : > { %p103_p3 = scmp.ne.s32.totalorder %s1820_s19, %s1816_s18  ;;  %p2222_p4 = scmp.eq.s32.totalorder %s1892_s22, 0 }
   0xc   : > { %s1908_s27 = scalar_select %p88_p1, %s1824_s20, %s90_s25  }
   0xd   : > { %p1910_p5 = por %p98_p2, %p97_p0  ;;  %p1916_p6 = por %p2222_p4, %p103_p3 }
   0xe   : > { %2228 = sst [smem:[#allocation13_spill]] %s1908_s27  ;;  %p153_p7 = scmp.eq.s32.totalorder %s1892_s22, 1 }
   0xf   : > { %s2230_s29 = scalar_select %p1916_p6, 1, 0 }
  0x10   : > { %p159_p8 = scmp.eq.s32.totalorder %s1318_s23, 1  ;;  %p1319_p9 = scmp.ge.s32.totalorder %s1828_s21, 1 }
  0x11   : > { %p166_p10 = scmp.lt.s32.totalorder %s1828_s21, 3  ;;  %p1923_p11 = por %p153_p7, %p97_p0 }
  0x12   : > { %p1927_p12 = por %p159_p8, %p103_p3  ;;  %s1830_s8 = smov [#allocation2]  }
  0x13   : > { %s2231_s30 = scalar_select %p1923_p11, 1, 0 }
  0x14   : > { %s2232_s6 = scalar_select %p1927_p12, 1, 0 }
  0x15   : > { %p1931_p13 = pnand %p1319_p9, %p166_p10  ;;  %s179_s9 = sshll.u32 %s1830_s8, 4  ;;  %s180_s9 = int_to_ptr.vmem [resolvable:$true] %s179_s9 }
  0x16   : > { %p1483_p4 = scmp.lt.s32.totalorder %s1828_s21, 2  ;;  %p2234_p0 = scmp.eq.s32.totalorder %s1892_s22, 0 }
  0x17   : > { %s2233_s7 = scalar_select %p1931_p13, 1, 0 }
  0x18   : > { %p1466_p2 = pneg %p1931_p13  ;;  %p1947_p3 = pnand %p1483_p4, %p1910_p5 }
  0x19   : > { %s1831_s12 = smov [#allocation5]   ;;  %s2237_s0 = sld [smem:[#allocation14_spill]] }
  0x1a   : > { %p1941_p7 = pnand %p1466_p2, %p2234_p0  ;;  %s189_s13 = sshll.u32 %s1831_s12, 4  ;;  %s1951_s13 = int_to_ptr.vmem [resolvable:$true] %s189_s13 }
  0x1b   : > { %s2236_s11 = scalar_select %p1947_p3, 1, 0 }
  0x1c   : > { %p1670_p9 = pneg %p1941_p7 }
  0x1f   : > { %s1668_s16 = scalar_lea.hbm %s2237_s0, 128 }
  0x20   : > { %p1669_p8 = scmp.ne.s32.totalorder %s2237_s0, %s1668_s16  ;;  %p1675_p10 = scmp.lt.u32.totalorder %s1668_s16, %s2237_s0 }
  0x22   : > { %p1671_p4 = pnand %p1670_p9, %p1669_p8 }
  0x24   : > { %p1672_p5 = pneg %p1671_p4 }
  0x26   : > { %p1677_p2 = pnand %p1675_p10, %p1672_p5 }
  0x28   : > { %1680 = shalt.err (!%p1677_p2)
}
  0x29   : > { %s1681_s28 = scalar_lea.vmem %s180_s9, 128  ;;  %p1689_p11 = scmp.lt.s32.totalorder %s180_s9, %s180_s9 }
  0x2a   : > { %p1682_p0 = scmp.ne.s32.totalorder %s180_s9, %s1681_s28  ;;  %p1690_p6 = scmp.lt.s32.totalorder %s1681_s28, %s1681_s28 }
  0x2c   : > { %p1684_p1 = pnand %p1682_p0, %p1670_p9  ;;  %p1691_p13 = por %p1690_p6, %p1689_p11 }
  0x2e   : > { %p1685_p12 = pneg %p1684_p1 }
  0x30   : > { %p1692_p3 = pnand %p1691_p13, %p1685_p12 }
  0x32   : > { %1695 = shalt.err (!%p1692_p3)
}
  0x33   : > { %1469 = dma.hbm_to_vmem [thread:$0]  (!%p1941_p7), %s2237_s0, 128, %s180_s9, [#allocation3]  }
  0x34   : > { %s206_s14 = sand.u32 1, %s1828_s21   ;;  %s1696_s17 = scalar_lea.hbm %s2217_s1, 2048 }
  0x35   : > { %p1697_p1 = scmp.ne.s32.totalorder %s2217_s1, %s1696_s17  ;;  %p1703_p12 = scmp.lt.u32.totalorder %s1696_s17, %s2217_s1 }
  0x37   : > { %p1699_p6 = pnand %p1697_p1, %p1670_p9 }
  0x39   : > { %p1700_p11 = pneg %p1699_p6 }
  0x3b   : > { %p1705_p13 = pnand %p1703_p12, %p1700_p11 }
  0x3d   : > { %1708 = shalt.err (!%p1705_p13)
}
  0x3e   : > { %s1709_s9 = scalar_lea.vmem %s1951_s13, 2048  ;;  %p1717_p5 = scmp.lt.s32.totalorder %s1951_s13, %s1951_s13 }
  0x3f   : > { %p1710_p3 = scmp.ne.s32.totalorder %s1951_s13, %s1709_s9  ;;  %p1718_p10 = scmp.lt.s32.totalorder %s1709_s9, %s1709_s9 }
  0x41   : > { %p1712_p8 = pnand %p1710_p3, %p1670_p9  ;;  %p1719_p2 = por %p1718_p10, %p1717_p5 }
  0x43   : > { %p1713_p4 = pneg %p1712_p8 }
  0x45   : > { %p1720_p0 = pnand %p1719_p2, %p1713_p4 }
  0x47   : > { %1723 = shalt.err (!%p1720_p0)
}
  0x48   : > { %s1832_s8 = smov 128   ;;  %s1833_s12 = smov 8  }
  0x49   : > { %1472 = dma.hbm_to_vmem [thread:$0]  (!%p1941_p7), %s2217_s1, 2048, %s1951_s13, [#allocation6], %s1832_s8, %s1832_s8, %s1833_s12  }
  0x4a   : > { %s208_s17 = sand.u32 1, %s1824_s20   ;;  %s1427_s25 = smul.u32 320, %s1828_s21 }
  0x4b   : > { %s1451_s23 = smul.u32 640, %s208_s17  ;;  %s2010_s10 = scalar_lea.sflag [#allocation3], %s206_s14 }
  0x4c   : > { %s2006_s9 = scalar_lea.hbm %s2219_s3, %s1427_s25  ;;  %p2238_p9 = scmp.ne.s32.totalorder %s2236_s11, 0 }
  0x4d   : > { %s210_s0 = scalar_lea.vmem [#allocation7], %s1451_s23  ;;  %s1724_s15 = scalar_lea.hbm %s2006_s9, 10240 }
  0x4e   : > { %s217_s27 = sshll.u32 %s210_s0, 4  ;;  %p1725_p7 = scmp.ne.s32.totalorder %s2006_s9, %s1724_s15  ;;  %s2008_s27 = int_to_ptr.vmem [resolvable:$true] %s217_s27 }
  0x4f   : > { %p1726_p1 = pneg %p2238_p9  ;;  %s1729_s12 = scalar_lea.hbm %s2219_s3, 20480 }
  0x50   : > { %p1730_p12 = scmp.lt.u32.totalorder %s2006_s9, %s2219_s3  ;;  %p1731_p13 = scmp.lt.u32.totalorder %s1729_s12, %s1724_s15 }
  0x51   : > { %p1727_p6 = pnand %p1726_p1, %p1725_p7  ;;  %p1733_p8 = scmp.lt.u32.totalorder %s1724_s15, %s2006_s9 }
  0x52   : > { %p1732_p3 = por %p1731_p13, %p1730_p12 }
  0x53   : > { %p1728_p11 = pneg %p1727_p6 }
  0x54   : > { %p1734_p4 = por %p1733_p8, %p1732_p3 }
  0x56   : > { %p1735_p5 = pnand %p1734_p4, %p1728_p11 }
  0x58   : > { %1738 = shalt.err (!%p1735_p5)
}
  0x59   : > { %s1739_s0 = scalar_lea.vmem %s2008_s27, 10240  ;;  %s1834_s14 = smov [#allocation7]  }
  0x5a   : > { %p1740_p10 = scmp.ne.s32.totalorder %s2008_s27, %s1739_s0  ;;  %s1744_s23 = sshll.u32 %s1834_s14, 4  ;;  %s1745_s23 = int_to_ptr.vmem [resolvable:$false] %s1744_s23 }
  0x5b   : > { %s1746_s25 = scalar_lea.vmem %s1745_s23, 20480  ;;  %p1747_p7 = scmp.lt.s32.totalorder %s2008_s27, %s1745_s23 }
  0x5c   : > { %p1742_p2 = pnand %p1740_p10, %p1726_p1  ;;  %p1748_p6 = scmp.lt.s32.totalorder %s1746_s25, %s1739_s0 }
  0x5e   : > { %p1743_p0 = pneg %p1742_p2  ;;  %p1749_p12 = por %p1748_p6, %p1747_p7 }
  0x60   : > { %p1750_p13 = pnand %p1749_p12, %p1743_p0 }
  0x62   : > { %1753 = shalt.err (!%p1750_p13)
}
  0x63   : > { %s1835_s26 = smov 640   ;;  %s1836_s28 = smov 320  }
  0x64   : > { %s1837_s15 = smov 20   ;;  %p2239_p1 = scmp.ne.s32.totalorder %s2233_s7, 0 }
  0x65   : > { %1476 = dma.hbm_to_vmem [thread:$0]  (!%p2238_p9), %s2006_s9, 10240, %s2008_s27, %s2010_s10, %s1835_s26, %s1836_s28, %s1837_s15  }
  0x66   : > { %237 = sbr.rel (%p2239_p1) target bundleno = 702 (0x2be), region = 40  ;;  %p2240_p11 = scmp.eq.s32.totalorder (!%p2239_p1), %s1892_s22, 0 }
  0x6d   : > { %1799 = dma.done.wait (%p2240_p11), [#allocation3], 128   ;;  %p2241_p3 = pmov %p2240_p11 }
  0x6f   : > { %1801 = vsyncadd (%p2241_p3), [#allocation3], 4294967168  ;;  %p2242_p8 = pmov %p2241_p3 }
  0x70   : > { %p2243_p4 = pmov %p2241_p3 }
  0x71   : > { %1803 = dma.done.wait (%p2242_p8), [#allocation6], 2048  }
  0x72   : > { %1805 = vsyncadd (%p2243_p4), [#allocation6], 4294965248  ;;  %s247_s11 = sand.u32 1, %s1892_s22   ;;  %s2050_s27 = sand.u32 1, %s1820_s19  }
  0x73   : > { %s1452_s7 = smul.u32 640, %s2050_s27  ;;  %s248_s9 = scalar_lea.sflag [#allocation3], %s247_s11 }
  0x74   : > { %p2244_p9 = scmp.ne.s32.totalorder %s2230_s29, 0 }
  0x75   : > { %s2053_s10 = scalar_lea.vmem [#allocation7], %s1452_s7 }
  0x76   : > { %1807 = dma.done.wait (%p2244_p9), %s248_s9, 10240  }
  0x77   : > { %1809 = vsyncadd (%p2244_p9), %s248_s9, 4294957056  ;;  %v1838_v0 = vmov 0   ;;  %v1528_v1 = vld [vmem:[#allocation5 + $0x4] ss:$8 sps:$4 sm:$0xff]   ;;  %v1530_v2 = vld [vmem:[#allocation5] ss:$8 sps:$4 sm:$0xff]  }
  0x78   : > { %420 = vmatprep.mubr.bf16.mxu0 %v1838_v0  ;;  %388 = vmatprep.subr.bf16.mxu0 %v1528_v1  ;;  %v1531_v3 = vld [vmem:[#allocation5 + $0x14] ss:$8 sps:$4 sm:$0xff]   ;;  %v1533_v4 = vld [vmem:[#allocation5 + $0x10] ss:$8 sps:$4 sm:$0xff]   ;;  %v1534_v5 = vld [vmem:[#allocation5 + $0x24] ss:$8 sps:$4 sm:$0xff]  }
  0x79   : > { %389 = vmatpush1.bf16.msra.mxu0 %v1530_v2  ;;  %v1536_v6 = vld [vmem:[#allocation5 + $0x20] ss:$8 sps:$4 sm:$0xff]   ;;  %v1537_v7 = vld [vmem:[#allocation5 + $0x34] ss:$8 sps:$4 sm:$0xff]   ;;  %v1539_v8 = vld [vmem:[#allocation5 + $0x30] ss:$8 sps:$4 sm:$0xff]  }
  0x7a   : > { %390 = vmatprep.subr.bf16.mxu0 %v1531_v3  ;;  %v1540_v9 = vld [vmem:[#allocation5 + $0x44] ss:$8 sps:$4 sm:$0xff]   ;;  %v1542_v10 = vld [vmem:[#allocation5 + $0x40] ss:$8 sps:$4 sm:$0xff]   ;;  %v1543_v11 = vld [vmem:[#allocation5 + $0x54] ss:$8 sps:$4 sm:$0xff]  }
  0x7b   : > { %v1545_v12 = vld [vmem:[#allocation5 + $0x50] ss:$8 sps:$4 sm:$0xff]   ;;  %v1546_v13 = vld [vmem:[#allocation5 + $0x64] ss:$8 sps:$4 sm:$0xff]   ;;  %v1548_v14 = vld [vmem:[#allocation5 + $0x60] ss:$8 sps:$4 sm:$0xff]  }
  0x7c   : > { %v1549_v15 = vld [vmem:[#allocation5 + $0x74] ss:$8 sps:$4 sm:$0xff]   ;;  %v1551_v16 = vld [vmem:[#allocation5 + $0x70] ss:$8 sps:$4 sm:$0xff]   ;;  %v1557_v21 = vld [vmem:[%s2053_s10 + $0xc] ss:$20 sps:$4 sm:$0xff]  }
  0x7d   : > { %391 = vmatpush1.bf16.msra.mxu0 %v1533_v4  ;;  %v290_v17 = vld [vmem:[#allocation2] sm:$0xff]  ;;  %v1554_v20 = vld [vmem:[%s2053_s10] ss:$20 sps:$4 sm:$0xff]   ;;  %v1561_v26 = vld [vmem:[%s2053_s10 + $0x30] ss:$20 sps:$4 sm:$0xff]   ;;  %s283_s16 = smul.u32 5, %s1892_s22 }
  0x7e   : > { %392 = vmatprep.subr.bf16.mxu0 %v1534_v5  ;;  %v291_v18 = vpack.c.bf16 %v290_v17, %v290_v17  ;;  %v1552_v19 = vld [vmem:[%s2053_s10 + $0x4] ss:$20 sps:$4 sm:$0xff]   ;;  %v1555_v22 = vld [vmem:[%s2053_s10 + $0x8] ss:$20 sps:$4 sm:$0xff]   ;;  %v1558_v23 = vld [vmem:[%s2053_s10 + $0x2c] ss:$20 sps:$4 sm:$0xff]  }
  0x7f   : > { %1078 = vmatprep.subr.bf16.mxu1 %v1552_v19  ;;  %v1560_v24 = vld [vmem:[%s2053_s10 + $0x28] ss:$20 sps:$4 sm:$0xff]   ;;  %v1566_v28 = vld [vmem:[%s2053_s10 + $0x50] ss:$20 sps:$4 sm:$0xff]   ;;  %v1567_v30 = vld [vmem:[%s2053_s10 + $0x58] ss:$20 sps:$4 sm:$0xff]  }
  0x80   : > { %1079 = vmatpush1.bf16.msra.mxu1 %v1554_v20  ;;  %v1563_v25 = vld [vmem:[%s2053_s10 + $0x34] ss:$20 sps:$4 sm:$0xff]   ;;  %v1569_v29 = vld [vmem:[%s2053_s10 + $0x5c] ss:$20 sps:$4 sm:$0xff]   ;;  %v1572_v32 = vld [vmem:[%s2053_s10 + $0x78] ss:$20 sps:$4 sm:$0xff]  }
  0x81   : > { %393 = vmatpush1.bf16.msra.mxu0 %v1536_v6  ;;  %1080 = vmatprep.subr.bf16.mxu1 %v1558_v23  ;;  %v1564_v27 = vld [vmem:[%s2053_s10 + $0x54] ss:$20 sps:$4 sm:$0xff]   ;;  %v1570_v31 = vld [vmem:[%s2053_s10 + $0x7c] ss:$20 sps:$4 sm:$0xff]   ;;  %v1575_v33 = vld [vmem:[%s2053_s10 + $0x84] ss:$20 sps:$4 sm:$0xff]  }
  0x82   : > { %394 = vmatprep.subr.bf16.mxu0 %v1537_v7  ;;  %v1573_v34 = vld [vmem:[%s2053_s10 + $0x80] ss:$20 sps:$4 sm:$0xff]   ;;  %v1576_v35 = vld [vmem:[%s2053_s10 + $0xa4] ss:$20 sps:$4 sm:$0xff]   ;;  %v1579_v38 = vld [vmem:[%s2053_s10 + $0xa8] ss:$20 sps:$4 sm:$0xff]  }
  0x83   : > { %v1578_v36 = vld [vmem:[%s2053_s10 + $0xa0] ss:$20 sps:$4 sm:$0xff]   ;;  %v1584_v40 = vld [vmem:[%s2053_s10 + $0xc8] ss:$20 sps:$4 sm:$0xff]   ;;  %v1585_v42 = vld [vmem:[%s2053_s10 + $0xd0] ss:$20 sps:$4 sm:$0xff]  }
  0x84   : > { %1081 = vmatpush1.bf16.msra.mxu1 %v1560_v24  ;;  %v1581_v37 = vld [vmem:[%s2053_s10 + $0xac] ss:$20 sps:$4 sm:$0xff]   ;;  %v1587_v41 = vld [vmem:[%s2053_s10 + $0xd4] ss:$20 sps:$4 sm:$0xff]   ;;  %v1590_v44 = vld [vmem:[%s2053_s10 + $0xf0] ss:$20 sps:$4 sm:$0xff]  }
  0x85   : > { %395 = vmatpush1.bf16.msra.mxu0 %v1539_v8  ;;  %1082 = vmatprep.subr.bf16.mxu1 %v1564_v27  ;;  %v1582_v39 = vld [vmem:[%s2053_s10 + $0xcc] ss:$20 sps:$4 sm:$0xff]   ;;  %v1588_v43 = vld [vmem:[%s2053_s10 + $0xf4] ss:$20 sps:$4 sm:$0xff]   ;;  %v1593_v45 = vld [vmem:[%s2053_s10 + $0xfc] ss:$20 sps:$4 sm:$0xff]  }
  0x86   : > { %396 = vmatprep.subr.bf16.mxu0 %v1540_v9  ;;  %v1591_v46 = vld [vmem:[%s2053_s10 + $0xf8] ss:$20 sps:$4 sm:$0xff]   ;;  %v1594_v47 = vld [vmem:[%s2053_s10 + $0x11c] ss:$20 sps:$4 sm:$0xff]   ;;  %v1597_v50 = vld [vmem:[%s2053_s10 + $0x120] ss:$20 sps:$4 sm:$0xff]  }
  0x87   : > { %v1596_v48 = vld [vmem:[%s2053_s10 + $0x118] ss:$20 sps:$4 sm:$0xff]   ;;  %v1602_v52 = vld [vmem:[%s2053_s10 + $0x140] ss:$20 sps:$4 sm:$0xff]   ;;  %v1603_v54 = vld [vmem:[%s2053_s10 + $0x148] ss:$20 sps:$4 sm:$0xff]  }
  0x88   : > { %1083 = vmatpush1.bf16.msra.mxu1 %v1566_v28  ;;  %v1599_v49 = vld [vmem:[%s2053_s10 + $0x124] ss:$20 sps:$4 sm:$0xff]   ;;  %v1605_v53 = vld [vmem:[%s2053_s10 + $0x14c] ss:$20 sps:$4 sm:$0xff]   ;;  %v1608_v56 = vld [vmem:[%s2053_s10 + $0x168] ss:$20 sps:$4 sm:$0xff]  }
  0x89   : > { %397 = vmatpush1.bf16.msra.mxu0 %v1542_v10  ;;  %1084 = vmatprep.subr.bf16.mxu1 %v1570_v31  ;;  %v1600_v51 = vld [vmem:[%s2053_s10 + $0x144] ss:$20 sps:$4 sm:$0xff]   ;;  %v1606_v55 = vld [vmem:[%s2053_s10 + $0x16c] ss:$20 sps:$4 sm:$0xff]   ;;  %v1611_v57 = vld [vmem:[%s2053_s10 + $0x174] ss:$20 sps:$4 sm:$0xff]  }
  0x8a   : > { %398 = vmatprep.subr.bf16.mxu0 %v1543_v11  ;;  %v1609_v58 = vld [vmem:[%s2053_s10 + $0x170] ss:$20 sps:$4 sm:$0xff]   ;;  %v1612_v59 = vld [vmem:[%s2053_s10 + $0x194] ss:$20 sps:$4 sm:$0xff]   ;;  %v1615_v62 = vld [vmem:[%s2053_s10 + $0x198] ss:$20 sps:$4 sm:$0xff]  }
  0x8b   : > { %v1614_v60 = vld [vmem:[%s2053_s10 + $0x190] ss:$20 sps:$4 sm:$0xff]   ;;  %v1620_v0 = vld [vmem:[%s2053_s10 + $0x1b8] ss:$20 sps:$4 sm:$0xff]   ;;  %v1621_v2 = vld [vmem:[%s2053_s10 + $0x1c0] ss:$20 sps:$4 sm:$0xff]  }
  0x8c   : > { %1085 = vmatpush1.bf16.msra.mxu1 %v1572_v32  ;;  %v1617_v61 = vld [vmem:[%s2053_s10 + $0x19c] ss:$20 sps:$4 sm:$0xff]   ;;  %v1623_v1 = vld [vmem:[%s2053_s10 + $0x1c4] ss:$20 sps:$4 sm:$0xff]   ;;  %v1626_v4 = vld [vmem:[%s2053_s10 + $0x1e0] ss:$20 sps:$4 sm:$0xff]  }
  0x8d   : > { %399 = vmatpush1.bf16.msra.mxu0 %v1545_v12  ;;  %1086 = vmatprep.subr.bf16.mxu1 %v1576_v35  ;;  %v1618_v63 = vld [vmem:[%s2053_s10 + $0x1bc] ss:$20 sps:$4 sm:$0xff]   ;;  %v1624_v3 = vld [vmem:[%s2053_s10 + $0x1e4] ss:$20 sps:$4 sm:$0xff]   ;;  %v1629_v5 = vld [vmem:[%s2053_s10 + $0x1ec] ss:$20 sps:$4 sm:$0xff]  }
  0x8e   : > { %400 = vmatprep.subr.bf16.mxu0 %v1546_v13  ;;  %v1627_v6 = vld [vmem:[%s2053_s10 + $0x1e8] ss:$20 sps:$4 sm:$0xff]   ;;  %v1630_v7 = vld [vmem:[%s2053_s10 + $0x20c] ss:$20 sps:$4 sm:$0xff]   ;;  %v1633_v10 = vld [vmem:[%s2053_s10 + $0x210] ss:$20 sps:$4 sm:$0xff]  }
  0x8f   : > { %v1632_v8 = vld [vmem:[%s2053_s10 + $0x208] ss:$20 sps:$4 sm:$0xff]   ;;  %v1638_v13 = vld [vmem:[%s2053_s10 + $0x230] ss:$20 sps:$4 sm:$0xff]   ;;  %v1644_v17 = vld [vmem:[%s2053_s10 + $0x258] ss:$20 sps:$4 sm:$0xff]  }
  0x90   : > { %1087 = vmatpush1.bf16.msra.mxu1 %v1578_v36  ;;  %v1635_v9 = vld [vmem:[%s2053_s10 + $0x214] ss:$20 sps:$4 sm:$0xff]   ;;  %v1641_v12 = vld [vmem:[%s2053_s10 + $0x23c] ss:$20 sps:$4 sm:$0xff]   ;;  %p284_p5 = scmp.lt.s32.totalorder %s283_s16, 9  ;;  %s1453_s23 = smul.u32 40, %s2050_s27 }
  0x91   : > { %401 = vmatpush1.bf16.msra.mxu0 %v1548_v14  ;;  %1088 = vmatprep.subr.bf16.mxu1 %v1582_v39  ;;  %v1636_v11 = vld [vmem:[%s2053_s10 + $0x234] ss:$20 sps:$4 sm:$0xff]   ;;  %v1639_v14 = vld [vmem:[%s2053_s10 + $0x238] ss:$20 sps:$4 sm:$0xff]   ;;  %v1648_v19 = vld [vmem:[%s2053_s10 + $0x150] ss:$20 sps:$4 sm:$0xff]  }
  0x92   : > { %402 = vmatprep.subr.bf16.mxu0 %v1549_v15  ;;  %v1642_v15 = vld [vmem:[%s2053_s10 + $0x25c] ss:$20 sps:$4 sm:$0xff]   ;;  %s2254_s16 = smov (!%p284_p5, %s283_s16), 9  ;;  %s281_s25 = scalar_lea.vmem [#allocation8], %s1453_s23 }
  0x93   : > { %s286_s14 = scalar_lea.vmem %s2220_s4, %s2254_s16  ;;  %s1428_s26 = smul.u32 640, %s1892_s22 }
  0x94   : > { %1089 = vmatpush1.bf16.msra.mxu1 %v1584_v40  ;;  %s1220_s28 = sshll.u32 %s281_s25, 4  ;;  %s1206_s9 = scalar_lea.sflag [#allocation4], %s2050_s27  ;;  %s2174_s28 = int_to_ptr.vmem [resolvable:$true] %s1220_s28 }
  0x95   : > { %403 = vmatpush1.bf16.msra.mxu0 %v1551_v16  ;;  %1090 = vmatprep.subr.bf16.mxu1 %v1588_v43  ;;  %v1647_v16 = vld [vmem:[%s2053_s10 + $0x264] ss:$20 sps:$4 sm:$0xff]   ;;  %s2172_s7 = scalar_lea.hbm %s2221_s5, %s1428_s26  ;;  %p2245_p2 = scmp.ne.s32.totalorder %s2231_s30, 0 }
  0x96   : > { %1119 = vmatprep.subr.bf16.mxu0 %v1557_v21  ;;  %s1840_s22 = smov [#allocation8]  }
  0x97   : > { %s1758_s29 = sshll.u32 %s1840_s22, 4  ;;  %s1759_s29 = int_to_ptr.vmem [resolvable:$false] %s1758_s29 }
  0x98   : > { %421 = vmatmul.mubr.bf16.vlgmr.msra.gmra.mrb[0].mxu0 %v291_v18  ;;  %1091 = vmatpush1.bf16.msra.mxu1 %v1590_v44  ;;  %v1645_v18 = vld [vmem:[%s2053_s10 + $0x260] ss:$20 sps:$4 sm:$0xff]   ;;  %s1760_s13 = scalar_lea.vmem %s1759_s29, 1280  ;;  %p1761_p6 = scmp.lt.s32.totalorder %s2174_s28, %s1759_s29 }
  0x99   : > { %1120 = vmatpush1.bf16.msra.mxu0 %v1555_v22  ;;  %1092 = vmatprep.subr.bf16.mxu1 %v1594_v47 }
  0x9a   : > { %1121 = vmatprep.subr.bf16.mxu0 %v1563_v25 }
  0x9c   : > { %1093 = vmatpush1.bf16.msra.mxu1 %v1596_v48 }
  0x9d   : > { %1122 = vmatpush1.bf16.msra.mxu0 %v1561_v26  ;;  %1094 = vmatprep.subr.bf16.mxu1 %v1600_v51 }
  0x9e   : > { %1123 = vmatprep.subr.bf16.mxu0 %v1569_v29 }
  0xa0   : > { %1095 = vmatpush1.bf16.msra.mxu1 %v1602_v52 }
  0xa1   : > { %1124 = vmatpush1.bf16.msra.mxu0 %v1567_v30  ;;  %1096 = vmatprep.subr.bf16.mxu1 %v1606_v55 }
  0xa2   : > { %1125 = vmatprep.subr.bf16.mxu0 %v1575_v33 }
  0xa4   : > { %1097 = vmatpush1.bf16.msra.mxu1 %v1608_v56 }
  0xa5   : > { %1126 = vmatpush1.bf16.msra.mxu0 %v1573_v34  ;;  %1098 = vmatprep.subr.bf16.mxu1 %v1612_v59 }
  0xa6   : > { %1127 = vmatprep.subr.bf16.mxu0 %v1581_v37 }
  0xa8   : > { %1099 = vmatpush1.bf16.msra.mxu1 %v1614_v60  ;;  %v475_v60 = vlaneseq }
  0xa9   : > { %1128 = vmatpush1.bf16.msra.mxu0 %v1579_v38  ;;  %1100 = vmatprep.subr.bf16.mxu1 %v1618_v63 }
  0xaa   : > { %1129 = vmatprep.subr.bf16.mxu0 %v1587_v41 }
  0xac   : > { %1101 = vmatpush1.bf16.msra.mxu1 %v1620_v0 }
  0xad   : > { %1130 = vmatpush1.bf16.msra.mxu0 %v1585_v42  ;;  %1102 = vmatprep.subr.bf16.mxu1 %v1624_v3 }
  0xae   : > { %1131 = vmatprep.subr.bf16.mxu0 %v1593_v45 }
  0xb0   : > { %1103 = vmatpush1.bf16.msra.mxu1 %v1626_v4  ;;  %v462_v4 = vld [vmem:[%s2218_s2] ss:$2 sm:$0x3] }
  0xb1   : > { %1132 = vmatpush1.bf16.msra.mxu0 %v1591_v46  ;;  %1104 = vmatprep.subr.bf16.mxu1 %v1630_v7 }
  0xb2   : > { %1133 = vmatprep.subr.bf16.mxu0 %v1599_v49 }
  0xb4   : > { %1105 = vmatpush1.bf16.msra.mxu1 %v1632_v8 }
  0xb5   : > { %1134 = vmatpush1.bf16.msra.mxu0 %v1597_v50  ;;  %1106 = vmatprep.subr.bf16.mxu1 %v1636_v11 }
  0xb6   : > { %1135 = vmatprep.subr.bf16.mxu0 %v1605_v53 }
  0xb8   : > { %1107 = vmatpush1.bf16.msra.mxu1 %v1638_v13 }
  0xb9   : > { %1136 = vmatpush1.bf16.msra.mxu0 %v1603_v54  ;;  %1108 = vmatprep.subr.bf16.mxu1 %v1642_v15 }
  0xba   : > { %1137 = vmatprep.subr.bf16.mxu0 %v1611_v57 }
  0xbc   : > { %1109 = vmatpush1.bf16.msra.mxu1 %v1644_v17  ;;  %v1343_v17 = vld [vmem:[%s2218_s2 + $0x1] ss:$2 sm:$0x3] }
  0xbd   : > { %1138 = vmatpush1.bf16.msra.mxu0 %v1609_v58  ;;  %1429 = vmatprep.subr.bf16.mxu1 %v1648_v19  ;;  %v1839_v58 = vmov 1966171168  }
  0xbe   : > { %1139 = vmatprep.subr.bf16.mxu0 %v1617_v61  ;;  %v473_v59 = vunpack.c.l.s4 %v1839_v58 }
  0xc0   : > { %v474_v61 = vunpack.c.0.s8 %v473_v59 }
  0xc1   : > { %1140 = vmatpush1.bf16.msra.mxu0 %v1615_v62  ;;  %v2124_v62 = vshrl.u32 %v475_v60, 7 }
  0xc2   : > { %1141 = vmatprep.subr.bf16.mxu0 %v1623_v1 }
  0xc3   : > { %v477_v0 = vsub.s32 %v474_v61, %v2124_v62  ;;  %v2134_v7 = vsub.s32 1, %v2124_v62 }
  0xc5   : > { %1142 = vmatpush1.bf16.msra.mxu0 %v1621_v2 }
  0xc6   : > { %1143 = vmatprep.subr.bf16.mxu0 %v1629_v5 }
  0xc9   : > { %1144 = vmatpush1.bf16.msra.mxu0 %v1627_v6  ;;  %v2131_v6 = vsub.s32 0, %v2124_v62 }
  0xca   : > { %1145 = vmatprep.subr.bf16.mxu0 %v1635_v9 }
  0xcd   : > { %1146 = vmatpush1.bf16.msra.mxu0 %v1633_v10 }
  0xce   : > { %1147 = vmatprep.subr.bf16.mxu0 %v1641_v12 }
  0xd1   : > { %1148 = vmatpush1.bf16.msra.mxu0 %v1639_v14 }
  0xd2   : > { %1149 = vmatprep.subr.bf16.mxu0 %v1647_v16 }
  0xd5   : > { %1150 = vmatpush1.bf16.msra.mxu0 %v1645_v18 }
 0x16b   : > { %v422_v20 = vpop.f32.mrb[0].mxu0 }
 0x16c   : > { %v429_v21 = vrot.slane %v422_v20, 4  ;;  %v424_v22 = vpop.f32.mrb[1].mxu0 }
 0x16d   : > { %v435_v23 = vrot.slane %v424_v22, 4  ;;  %v426_v24 = vpop.f32.mrb[2].mxu0 }
 0x16e   : > { %v430_v25 = vadd.f32 %v429_v21, %v422_v20  ;;  %v427_v26 = vpop.f32.mrb[3].mxu0 }
 0x16f   : > { %v436_v27 = vadd.f32 %v435_v23, %v424_v22 }
 0x170   : > { %v431_v28 = vrot.slane %v430_v25, 2 }
 0x171   : > { %v437_v29 = vrot.slane %v436_v27, 2 }
 0x172   : > { %v432_v30 = vadd.f32 %v431_v28, %v430_v25  ;;  %v1649_v28 = vld [vmem:[%s2053_s10 + $0x10] ss:$20 sps:$4 sm:$0xff]  }
 0x173   : > { %v438_v31 = vadd.f32 %v437_v29, %v436_v27  ;;  %v1650_v29 = vld [vmem:[%s2053_s10 + $0x178] ss:$20 sps:$4 sm:$0xff]  }
 0x174   : > { %v433_v32 = vrot.slane %v432_v30, 1 }
 0x175   : > { %v439_v33 = vrot.slane %v438_v31, 1 }
 0x176   : > { %v434_v34 = vadd.f32 %v433_v32, %v432_v30  ;;  %v1651_v30 = vld [vmem:[%s2053_s10 + $0x38] ss:$20 sps:$4 sm:$0xff]   ;;  %v1653_v32 = vld [vmem:[%s2053_s10 + $0x60] ss:$20 sps:$4 sm:$0xff]  }
 0x177   : > { %v440_v35 = vadd.f32 %v439_v33, %v438_v31  ;;  %v1652_v31 = vld [vmem:[%s2053_s10 + $0x1a0] ss:$20 sps:$4 sm:$0xff]   ;;  %v1654_v33 = vld [vmem:[%s2053_s10 + $0x1c8] ss:$20 sps:$4 sm:$0xff]  }
 0x178   : > { %v442_v36 = vmul.f32 0.125, %v434_v34  ;;  %v1655_v34 = vld [vmem:[%s2053_s10 + $0x88] ss:$20 sps:$4 sm:$0xff]  }
 0x179   : > { %v443_v37 = vmul.f32 0.125, %v440_v35  ;;  %v1656_v35 = vld [vmem:[%s2053_s10 + $0x1f0] ss:$20 sps:$4 sm:$0xff]  }
 0x17a   : > { %v444_v38 = vsub.f32 %v422_v20, %v442_v36 }
 0x17b   : > { %v445_v39 = vsub.f32 %v424_v22, %v443_v37 }
 0x17c   : > { %v446_v40 = vmul.f32 %v444_v38, %v444_v38  ;;  %v1659_v38 = vld [vmem:[%s2053_s10 + $0xd8] ss:$20 sps:$4 sm:$0xff]  }
 0x17d   : > { %v447_v41 = vmul.f32 %v445_v39, %v445_v39  ;;  %v1660_v39 = vld [vmem:[%s2053_s10 + $0x240] ss:$20 sps:$4 sm:$0xff]  }
 0x17e   : > { %v448_v42 = vrot.slane %v446_v40, 4 }
 0x17f   : > { %v454_v43 = vrot.slane %v447_v41, 4 }
 0x180   : > { %v449_v44 = vadd.f32 %v448_v42, %v446_v40  ;;  %v1661_v40 = vld [vmem:[%s2053_s10 + $0x100] ss:$20 sps:$4 sm:$0xff]   ;;  %v1663_v42 = vld [vmem:[%s2053_s10 + $0x128] ss:$20 sps:$4 sm:$0xff]  }
 0x181   : > { %v455_v45 = vadd.f32 %v454_v43, %v447_v41  ;;  %v1662_v41 = vld [vmem:[%s2053_s10 + $0x268] ss:$20 sps:$4 sm:$0xff]   ;;  %v647_v43 = vsub.s32 2, %v2124_v62 }
 0x182   : > { %v450_v46 = vrot.slane %v449_v44, 2 }
 0x183   : > { %v456_v47 = vrot.slane %v455_v45, 2 }
 0x184   : > { %v451_v48 = vadd.f32 %v450_v46, %v449_v44  ;;  %v635_v44 = vld [vmem:[%s286_s14] sm:$0x1f] }
 0x185   : > { %v457_v49 = vadd.f32 %v456_v47, %v455_v45  ;;  %v651_v45 = vsub.s32 3, %v2124_v62  ;;  %v640_v46 = vrot.slane %v635_v44, %v2131_v6  ;;  %v648_v47 = vrot.slane %v635_v44, %v647_v43 }
 0x186   : > { %v452_v50 = vrot.slane %v451_v48, 1 }
 0x187   : > { %v458_v51 = vrot.slane %v457_v49, 1 }
 0x188   : > { %v453_v52 = vadd.f32 %v452_v50, %v451_v48  ;;  %v644_v48 = vrot.slane %v635_v44, %v2134_v7 }
 0x189   : > { %v459_v53 = vadd.f32 %v458_v51, %v457_v49  ;;  %v652_v49 = vrot.slane %v635_v44, %v651_v45 }
 0x18a   : > { %v460_v54 = vmul.f32 0.125, %v453_v52 }
 0x18b   : > { %v461_v55 = vmul.f32 0.125, %v459_v53 }
 0x18c   : > { %v465_v56 = vadd.f32 1e-05, %v460_v54 }
 0x18d   : > { %v466_v57 = vadd.f32 1e-05, %v461_v55 }
 0x18e   : > { %1664 = vrsqrt.f32 %v465_v56 }
 0x18f   : > { %1666 = vrsqrt.f32 %v466_v57 }
 0x198   : > { %v1665_v63 = vpop.eup %1664 }
 0x199   : > { %v1667_v1 = vpop.eup %1666 }
 0x19a   : > { %v471_v2 = vcombine.low %v1665_v63, %v1667_v1  ;;  %v655_v63 = vsub.s32 4, %v2124_v62 }
 0x19c   : > { %v478_v3 = vrot.slane %v471_v2, %v477_v0  ;;  %v656_v1 = vrot.slane %v635_v44, %v655_v63 }
 0x19e   : > { %v485_v5 = vrot.slane %v478_v3, %v477_v0 }
 0x1a0   : > { %v487_v8 = vmul.f32 %v485_v5, %v462_v4 }
 0x1a2   : > { %v492_v9 = vrot.slane %v487_v8, %v2131_v6  ;;  %v496_v10 = vrot.slane %v487_v8, %v2134_v7 }
 0x1a4   : > { %v499_v11 = vmul.f32 %v492_v9, %v442_v36  ;;  %v500_v12 = vmul.f32 %v496_v10, %v443_v37  ;;  %v521_v13 = vmul.f32 %v496_v10, %v424_v22  ;;  %v520_v14 = vmul.f32 %v492_v9, %v422_v20  ;;  %v1657_v36 = vld [vmem:[%s2053_s10 + $0xb0] ss:$20 sps:$4 sm:$0xff]   ;;  %v1658_v37 = vld [vmem:[%s2053_s10 + $0x218] ss:$20 sps:$4 sm:$0xff]   ;;  %s1754_s10 = scalar_lea.vmem %s2174_s28, 640 }
 0x1a5   : > { %p1755_p10 = scmp.ne.s32.totalorder %s2174_s28, %s1754_s10  ;;  %p1762_p12 = scmp.lt.s32.totalorder %s1760_s13, %s1754_s10 }
 0x1a6   : > { %v503_v15 = vcombine.low %v499_v11, %v500_v12 }
 0x1a7   : > { %p1756_p0 = pnand %p1755_p10, %p2245_p2  ;;  %p1763_p13 = por %p1762_p12, %p1761_p6 }
 0x1a8   : > { %v510_v16 = vrot.slane %v503_v15, %v477_v0 }
 0x1a9   : > { %p1757_p7 = pneg %p1756_p0 }
 0x1aa   : > { %v517_v18 = vrot.slane %v510_v16, %v477_v0 }
 0x1ab   : > { %p1764_p1 = pnand %p1763_p13, %p1757_p7 }
 0x1ac   : > { %v519_v19 = vsub.f32 %v1343_v17, %v517_v18 }
 0x1ae   : > { %v530_v21 = vrot.slane %v519_v19, %v2134_v7  ;;  %v526_v23 = vrot.slane %v519_v19, %v2131_v6 }
 0x1b0   : > { %v534_v24 = vadd.f32 %v530_v21, %v521_v13  ;;  %v533_v25 = vadd.f32 %v526_v23, %v520_v14 }
 0x1b2   : > { %v536_v26 = vmax.f32 %v534_v24, 0.0  ;;  %v535_v22 = vmax.f32 %v533_v25, 0.0 }
 0x1b4   : > { %v538_v20 = vpack.c.bf16 %v536_v26, %v536_v26  ;;  %v537_v27 = vpack.c.bf16 %v535_v22, %v535_v22 }
 0x1b6   : > { %1110 = vmatprep.mubr.bf16.mxu1 %v538_v20  ;;  %1151 = vmatprep.mubr.bf16.mxu0 %v538_v20 }
 0x1b7   : > { %1111 = vmatmul.mubr.bf16.vlgmr.msra.gmra.mrb[0].mxu1 %v537_v27  ;;  %1152 = vmatmul.mubr.bf16.vlgmr.msra.gmra.mrb[4].mxu0 %v537_v27 }
 0x1b8   : > { %1430 = vmatpush3.bf16.msra.mxu1 %v1649_v28  ;;  %1192 = vmatprep.mubr.bf16.mxu1 %v538_v20 }
 0x1b9   : > { %1431 = vmatprep.subr.bf16.mxu1 %v1650_v29 }
 0x1bc   : > { %1432 = vmatpush3.bf16.msra.mxu1 %v1651_v30 }
 0x1bd   : > { %1433 = vmatprep.subr.bf16.mxu1 %v1652_v31 }
 0x1c0   : > { %1434 = vmatpush3.bf16.msra.mxu1 %v1653_v32 }
 0x1c1   : > { %1435 = vmatprep.subr.bf16.mxu1 %v1654_v33 }
 0x1c4   : > { %1436 = vmatpush3.bf16.msra.mxu1 %v1655_v34 }
 0x1c5   : > { %1437 = vmatprep.subr.bf16.mxu1 %v1656_v35 }
 0x1c8   : > { %1438 = vmatpush3.bf16.msra.mxu1 %v1657_v36 }
 0x1c9   : > { %1439 = vmatprep.subr.bf16.mxu1 %v1658_v37 }
 0x1cc   : > { %1440 = vmatpush3.bf16.msra.mxu1 %v1659_v38 }
 0x1cd   : > { %1441 = vmatprep.subr.bf16.mxu1 %v1660_v39 }
 0x1d0   : > { %1442 = vmatpush3.bf16.msra.mxu1 %v1661_v40 }
 0x1d1   : > { %1443 = vmatprep.subr.bf16.mxu1 %v1662_v41 }
 0x1d4   : > { %1444 = vmatpush3.bf16.msra.mxu1 %v1663_v42 }
 0x1d7   : > { %1193 = vmatmul.mubr.bf16.vlgmr.msra.gmra.mrb[4].mxu1 %v537_v27 }
 0x28a   : > { %v1112_v50 = vpop.f32.mrb[0].mxu1  ;;  %v1153_v51 = vpop.f32.mrb[4].mxu0 }
 0x28b   : > { %v1113_v52 = vadd.f32 %v1112_v50, %v640_v46  ;;  %v1154_v53 = vadd.f32 %v1153_v51, %v648_v47  ;;  %v1114_v54 = vpop.f32.mrb[1].mxu1  ;;  %v1155_v55 = vpop.f32.mrb[5].mxu0 }
 0x28c   : > { %v1115_v56 = vadd.f32 %v1114_v54, %v644_v48  ;;  %v1156_v57 = vadd.f32 %v1155_v55, %v652_v49  ;;  %v1116_v58 = vpop.f32.mrb[2].mxu1  ;;  %v1157_v59 = vpop.f32.mrb[6].mxu0 }
 0x28d   : > { %1200 = vst [vmem:[%s281_s25] sm:$0xff] %v1113_v52  ;;  %1202 = vst [vmem:[%s281_s25 + $0x10] sm:$0xff] %v1154_v53  ;;  %v1117_v60 = vpop.f32.mrb[3].mxu1  ;;  %v1158_v61 = vpop.f32.mrb[7].mxu0 }
 0x28e   : > { %1201 = vst [vmem:[%s281_s25 + $0x8] sm:$0xff] %v1115_v56  ;;  %1203 = vst [vmem:[%s281_s25 + $0x18] sm:$0xff] %v1156_v57 }
 0x2aa   : > { %v1445_v0 = vpop.f32.mrb[4].mxu1 }
 0x2ab   : > { %v1446_v2 = vpop.f32.mrb[5].mxu1 }
 0x2ac   : > { %v1447_v3 = vadd.f32 %v1446_v2, %v1445_v0  ;;  %v1448_v4 = vpop.f32.mrb[6].mxu1 }
 0x2ad   : > { %v1449_v5 = vpop.f32.mrb[7].mxu1 }
 0x2ae   : > { %v1195_v6 = vadd.f32 %v1447_v3, %v656_v1 }
 0x2b0   : > { %1204 = vst [vmem:[%s281_s25 + $0x20] sm:$0xff] %v1195_v6 }
 0x2b1   : > { %1767 = shalt.err (!%p1764_p1)
}
 0x2b2   : > { %s1768_s27 = scalar_lea.hbm %s2172_s7, 640  ;;  %s1772_s16 = scalar_lea.hbm %s2221_s5, 1280 }
 0x2b3   : > { %p1769_p11 = scmp.ne.s32.totalorder %s2172_s7, %s1768_s27  ;;  %p1773_p4 = scmp.lt.u32.totalorder %s2172_s7, %s2221_s5 }
 0x2b4   : > { %p1774_p9 = scmp.lt.u32.totalorder %s1772_s16, %s1768_s27  ;;  %p1776_p10 = scmp.lt.u32.totalorder %s1768_s27, %s2172_s7 }
 0x2b5   : > { %p1770_p3 = pnand %p1769_p11, %p2245_p2 }
 0x2b6   : > { %p1775_p5 = por %p1774_p9, %p1773_p4 }
 0x2b7   : > { %p1771_p8 = pneg %p1770_p3 }
 0x2b8   : > { %p1777_p0 = por %p1776_p10, %p1775_p5 }
 0x2ba   : > { %p1778_p7 = pnand %p1777_p0, %p1771_p8 }
 0x2bc   : > { %1781 = shalt.err (!%p1778_p7)
}
 0x2bd   : > { %1464 = dma.vmem_to_hbm [thread:$0]  (%p2245_p2), %s2174_s28, 640, %s2172_s7, %s1206_s9  }
 0x2be PF: > { %s1232_s14 = sand.u32 1, %s1816_s18   ;;  %p2246_p6 = scmp.ne.s32.totalorder %s2232_s6, 0 }
 0x2bf   : > { %p2247_p12 = scmp.ge.s32.totalorder %s1828_s21, 2  ;;  %s1233_s23 = scalar_lea.sflag [#allocation4], %s1232_s14 }
 0x2c1   : > { %p1478_p13 = pnand %p2247_p12, %p2246_p6 }
 0x2c3   : > { %1811 = dma.done.wait (!%p1478_p13), %s1233_s23, 640  }
 0x2c4   : > { %1813 = vsyncadd (!%p1478_p13), %s1233_s23, 4294966656  ;;  %s2248_s25 = sld [smem:[#allocation13_spill]]  ;;  %p17_p1 = scmp.ge.s32.totalorder %s1896_s24, 4  }
 0x2c5   : > { %s2249_s18 = smov %s1820_s19  ;;  %s2250_s19 = smov %s1824_s20 }
 0x2c6   : > { %s2252_s21 = smov %s1896_s24  ;;  %19 = sbr.rel (!%p17_p1) target bundleno = 7 (0x7), region = 96 }
 0x2ca   : > { %s2251_s20 = smov %s2248_s25 }
 0x2cd   :  { %1238 = vsyncpa [#allocation3], 1 }
 0x2ce   :  { %1240 = vsyncpa [#allocation3 + $0x1], 1 }
 0x2cf   :  { %1241 = vsyncpa [#allocation6], 1 }
 0x2d0   :  { %1242 = vsyncpa [#allocation4], 1 }
 0x2d1   :  { %1244 = vsyncpa [#allocation4 + $0x1], 1 }

</bundles_post_ra>
